<compile_context>
chip_gen: v6e
topology: v6e:2x2x1
jax: 0.10.0
libtpu: 0.0.40
codegen_flags: <defaults>
</compile_context>

<pallas_src>
import functools

import jax
import jax.numpy as jnp
from jax import lax
from jax.experimental import pallas as pl
from jax.experimental.pallas import tpu as pltpu


def _attention_kernel(x_ref, wqkv_ref, wproj_ref, bproj_ref, o_ref,
                      k_scratch, v_scratch, out_scratch,
                      *, num_heads, head_dim, scale, tq):
    C = x_ref.shape[-1]
    qi = pl.program_id(1)

    # ---- K/V projection: once per batch element, hoisted off the query-tile axis. ----
    @pl.when(qi == 0)
    def _():
        xs = x_ref[...].astype(jnp.bfloat16)                                   # (N, C)
        kv = jnp.dot(xs, wqkv_ref[:, C:], preferred_element_type=jnp.float32)  # (N, 2C)
        k_scratch[...] = kv[:, :C].astype(jnp.bfloat16)
        v_scratch[...] = kv[:, C:].astype(jnp.bfloat16)

    # ---- Q projection for this query tile, sliced from the resident full-seq block. ----
    row = pl.multiple_of(qi * tq, tq)
    xq = x_ref[pl.ds(row, tq), :].astype(jnp.bfloat16)                         # (tq, C)
    q_all = jnp.dot(xq, wqkv_ref[:, :C], preferred_element_type=jnp.float32) * scale

    # ---- Per-head scaled-dot-product attention. ----
    # TODO(synk): group heads into 128-lane slabs (batched dot_general) for head_dim < 128
    # to make these slices / stores lane-dense, and use a fori_loop for num_heads >= 12.
    for h in range(num_heads):
        lo = h * head_dim
        hi = lo + head_dim
        qh = q_all[:, lo:hi].astype(jnp.bfloat16)                              # (tq, hd)
        kh = k_scratch[:, lo:hi]                                               # (N, hd) bf16
        vh = v_scratch[:, lo:hi]                                               # (N, hd) bf16

        # Contract the shared head dim directly: no kh.T relayout before the MXU push.
        s = lax.dot_general(qh, kh, (((1,), (1,)), ((), ())),
                            preferred_element_type=jnp.float32)                # (tq, N)

        # Numerically stable softmax in f32.  Normalization is applied AFTER P @ V so it
        # scales a (tq, hd) result instead of the (tq, N) matrix (N/hd fewer VPU muls).
        s = s - jnp.max(s, axis=-1, keepdims=True)
        p = jnp.exp(s)
        inv = pl.reciprocal(jnp.sum(p, axis=-1, keepdims=True), approx=True)   # (tq, 1)
        o_h = jnp.dot(p.astype(jnp.bfloat16), vh,
                      preferred_element_type=jnp.float32)                      # (tq, hd)
        out_scratch[:, lo:hi] = o_h * inv
        # attn_drop is Identity (rate 0.0)

    # ---- Output projection (with bias), once per tile.  proj_drop is Identity. ----
    y = jnp.dot(out_scratch[...].astype(jnp.bfloat16), wproj_ref[...],
                preferred_element_type=jnp.float32)
    o_ref[...] = (y + bproj_ref[...]).astype(o_ref.dtype)


def attention_forward(x, w_qkv, w_proj, b_proj, *, num_heads):
    """x: (B, N, C); w_qkv: (C, 3C); w_proj: (C, C); b_proj: (1, C)."""
    B, N, C = x.shape
    assert C % num_heads == 0
    head_dim = C // num_heads
    scale = head_dim ** (-0.5)

    # Parameters live in HBM as bf16: halves weight DMA bytes / VMEM footprint and removes
    # the per-grid-step VPU casts inside the kernel.  The bias is added in f32.
    w_qkv = w_qkv.astype(jnp.bfloat16)
    w_proj = w_proj.astype(jnp.bfloat16)
    b_proj = b_proj.astype(jnp.float32)

    # Query tile: large enough to fill the MXU M dimension, chosen to divide N exactly
    # so no padded/garbage query rows ever exist.
    if N % 256 == 0:
        tq = 256
    elif N % 128 == 0:
        tq = 128
    else:
        tq = N
    num_q_tiles = N // tq

    kernel = functools.partial(_attention_kernel, num_heads=num_heads,
                               head_dim=head_dim, scale=scale, tq=tq)

    flops = (2 * B * N * C * 3 * C      # qkv projection
             + 4 * B * N * N * C        # q @ k^T and p @ v
             + 2 * B * N * C * C)       # output projection
    cost = pl.CostEstimate(
        flops=flops,
        transcendentals=B * num_heads * N * N,                 # exp in softmax
        bytes_accessed=(2 * x.size * x.dtype.itemsize          # read x, write y
                        + w_qkv.size * 2 + w_proj.size * 2 + b_proj.size * 4))

    const_map = lambda b, qi: (0, 0)
    return pl.pallas_call(
        kernel,
        out_shape=jax.ShapeDtypeStruct((B, N, C), x.dtype),
        grid=(B, num_q_tiles),
        in_specs=[
            # Full sequence for this batch element; the query tile is sliced from this
            # resident block inside the kernel (no duplicate x operand / extra DMA).
            pl.BlockSpec((None, N, C), lambda b, qi: (b, 0, 0)),
            # Grid-invariant parameter blocks: single-buffered (no wasted second copy).
            pl.BlockSpec((C, 3 * C), const_map, pipeline_mode=pl.Buffered(1)),
            pl.BlockSpec((C, C), const_map, pipeline_mode=pl.Buffered(1)),
            pl.BlockSpec((1, C), const_map, pipeline_mode=pl.Buffered(1)),
        ],
        out_specs=pl.BlockSpec((None, tq, C), lambda b, qi: (b, qi, 0)),
        scratch_shapes=[
            pltpu.VMEM((N, C), jnp.bfloat16),   # K (whole sequence, current batch elem)
            pltpu.VMEM((N, C), jnp.bfloat16),   # V
            pltpu.VMEM((tq, C), jnp.float32),   # per-tile attention output (pre-proj)
        ],
        compiler_params=pltpu.CompilerParams(
            # b is independent (megacore-shardable on v7x); qi carries the K/V scratch so
            # it must stay sequential ("arbitrary") on a single core.
            dimension_semantics=("parallel", "arbitrary"),
            vmem_limit_bytes=64 * 1024 * 1024,
        ),
        cost_estimate=cost,
    )(x, w_qkv, w_proj, b_proj)


def attention_reference(x, w_qkv, w_proj, b_proj, *, num_heads):
    """Pure-JAX (f32) re-statement of the PyTorch forward, for validation."""
    B, N, C = x.shape
    hd = C // num_heads
    scale = hd ** (-0.5)
    qkv = x @ w_qkv                                                     # (B, N, 3C)
    qkv = qkv.reshape(B, N, 3, num_heads, hd).transpose(2, 0, 3, 1, 4)  # (3,B,H,N,hd)
    q, k, v = qkv[0], qkv[1], qkv[2]
    q = q * scale
    attn = jnp.einsum('bhnd,bhmd->bhnm', q, k)
    attn = jax.nn.softmax(attn, axis=-1)
    out = jnp.einsum('bhnm,bhmd->bhnd', attn, v)                        # (B,H,N,hd)
    out = out.transpose(0, 2, 1, 3).reshape(B, N, C)
    return out @ w_proj + b_proj


if __name__ == "__main__":
    # Small shapes consistent with the module: dim=32, num_heads=8 -> head_dim=4.
    B, N, C = 2, 8, 32
    num_heads = 8

    key = jax.random.PRNGKey(0)
    k_x, k_qkv, k_proj, k_bias = jax.random.split(key, 4)

    x = jax.random.normal(k_x, (B, N, C), dtype=jnp.float32)
    # Deterministic synthetic parameters (stored as (in, out), i.e. W^T of nn.Linear).
    w_qkv = jax.random.normal(k_qkv, (C, 3 * C), dtype=jnp.float32) * 0.05
    w_proj = jax.random.normal(k_proj, (C, C), dtype=jnp.float32) * 0.05
    b_proj = jax.random.normal(k_bias, (1, C), dtype=jnp.float32) * 0.02

    y = attention_forward(x, w_qkv, w_proj, b_proj, num_heads=num_heads)
    y = jax.block_until_ready(y)

    y_ref = attention_reference(x, w_qkv, w_proj, b_proj, num_heads=num_heads)
    assert y.shape == (B, N, C)
    # bf16 weights/MXU operands + approx reciprocal -> slightly looser tolerance than f32.
    assert jnp.allclose(y, y_ref, atol=1e-2, rtol=1e-2), "mismatch vs reference"

    print("KERNEL_OK")
</pallas_src>

<mosaic_0001>
module attributes {stable_mosaic.version = 11 : i64} {
  func.func @_attention_kernel(%arg0: i32, %arg1: i32, %arg2: memref<1x8x32xf32, #tpu.memory_space<vmem>>, %arg3: memref<32x96xbf16, #tpu.memory_space<vmem>>, %arg4: memref<32x32xbf16, #tpu.memory_space<vmem>>, %arg5: memref<1x32xf32, #tpu.memory_space<vmem>>, %arg6: memref<1x8x32xf32, #tpu.memory_space<vmem>>, %arg7: memref<8x32xbf16, #tpu.memory_space<vmem>>, %arg8: memref<8x32xbf16, #tpu.memory_space<vmem>>, %arg9: memref<8x32xf32, #tpu.memory_space<vmem>>) attributes {dimension_semantics = [#tpu.dimension_semantics<parallel>, #tpu.dimension_semantics<arbitrary>], iteration_bounds = array<i64: 2, 1>, scalar_prefetch = 0 : i64, scratch_operands = 3 : i64, tpu.core_type = #tpu.core_type<tc>, window_params = [{transform_indices = @transform_0, window_bounds = array<i64: 1, 8, 32>}, {pipeline_mode = #tpu.pipeline_mode<synchronous>, transform_indices = @transform_1, window_bounds = array<i64: 32, 96>}, {pipeline_mode = #tpu.pipeline_mode<synchronous>, transform_indices = @transform_2, window_bounds = array<i64: 32, 32>}, {pipeline_mode = #tpu.pipeline_mode<synchronous>, transform_indices = @transform_3, window_bounds = array<i64: 1, 32>}, {transform_indices = @transform_4, window_bounds = array<i64: 1, 8, 32>}]} {
    %c0_i32 = arith.constant 0 : i32
    %0 = arith.cmpi eq, %arg1, %c0_i32 : i32
    %1 = arith.extui %0 : i1 to i32
    %c0_i32_0 = arith.constant 0 : i32
    %2 = arith.cmpi ne, %1, %c0_i32_0 : i32
    scf.if %2 {
      %c0_88 = arith.constant 0 : index
      %c0_89 = arith.constant 0 : index
      %c0_90 = arith.constant 0 : index
      %167 = vector.load %arg2[%c0_88, %c0_89, %c0_90] : memref<1x8x32xf32, #tpu.memory_space<vmem>>, vector<1x8x32xf32>
      %168 = vector.shape_cast %167 : vector<1x8x32xf32> to vector<8x32xf32>
      %169 = arith.truncf %168 : vector<8x32xf32> to vector<8x32xbf16>
      %c0_91 = arith.constant 0 : index
      %c32 = arith.constant 32 : index
      %170 = vector.load %arg3[%c0_91, %c32] : memref<32x96xbf16, #tpu.memory_space<vmem>>, vector<32x64xbf16>
      %cst_92 = arith.constant dense<0.000000e+00> : vector<8x64xf32>
      %171 = tpu.matmul %169, %170, %cst_92 {dimension_numbers = #tpu.dot_dimension_numbers<[1], [0], [0], [1], [0, 0, 1, 1], [], []>} : vector<8x32xbf16>, vector<32x64xbf16>, vector<8x64xf32> -> vector<8x64xf32>
      %172 = vector.extract_strided_slice %171 {offsets = [0, 0], sizes = [8, 32], strides = [1, 1]} : vector<8x64xf32> to vector<8x32xf32>
      %173 = arith.truncf %172 : vector<8x32xf32> to vector<8x32xbf16>
      %c0_93 = arith.constant 0 : index
      %c0_94 = arith.constant 0 : index
      %174 = vector.load %arg7[%c0_93, %c0_94] : memref<8x32xbf16, #tpu.memory_space<vmem>>, vector<8x32xbf16>
      tpu.vector_store %arg7[%c0_93, %c0_94], %173 {strides = array<i32>} : memref<8x32xbf16, #tpu.memory_space<vmem>>, vector<8x32xbf16>,
      %175 = vector.extract_strided_slice %171 {offsets = [0, 32], sizes = [8, 32], strides = [1, 1]} : vector<8x64xf32> to vector<8x32xf32>
      %176 = arith.truncf %175 : vector<8x32xf32> to vector<8x32xbf16>
      %c0_95 = arith.constant 0 : index
      %c0_96 = arith.constant 0 : index
      %177 = vector.load %arg8[%c0_95, %c0_96] : memref<8x32xbf16, #tpu.memory_space<vmem>>, vector<8x32xbf16>
      tpu.vector_store %arg8[%c0_95, %c0_96], %176 {strides = array<i32>} : memref<8x32xbf16, #tpu.memory_space<vmem>>, vector<8x32xbf16>,
    } else {
    }
    %c8_i32 = arith.constant 8 : i32
    %3 = arith.muli %arg1, %c8_i32 : i32
    %4 = tpu.assume_multiple %3, 8 : i32
    %c0 = arith.constant 0 : index
    %5 = arith.index_cast %4 : i32 to index
    %c0_1 = arith.constant 0 : index
    %6 = vector.load %arg2[%c0, %5, %c0_1] : memref<1x8x32xf32, #tpu.memory_space<vmem>>, vector<1x8x32xf32>
    %7 = vector.shape_cast %6 : vector<1x8x32xf32> to vector<8x32xf32>
    %8 = arith.truncf %7 : vector<8x32xf32> to vector<8x32xbf16>
    %c0_2 = arith.constant 0 : index
    %c0_3 = arith.constant 0 : index
    %9 = vector.load %arg3[%c0_2, %c0_3] : memref<32x96xbf16, #tpu.memory_space<vmem>>, vector<32x32xbf16>
    %cst = arith.constant dense<0.000000e+00> : vector<8x32xf32>
    %10 = tpu.matmul %8, %9, %cst {dimension_numbers = #tpu.dot_dimension_numbers<[1], [0], [0], [1], [0, 0, 1, 1], [], []>} : vector<8x32xbf16>, vector<32x32xbf16>, vector<8x32xf32> -> vector<8x32xf32>
    %cst_4 = arith.constant 5.000000e-01 : f32
    %11 = vector.broadcast %cst_4 : f32 to vector<8x32xf32>
    %12 = arith.mulf %10, %11 : vector<8x32xf32>
    %13 = vector.extract_strided_slice %12 {offsets = [0, 0], sizes = [8, 4], strides = [1, 1]} : vector<8x32xf32> to vector<8x4xf32>
    %14 = arith.truncf %13 : vector<8x4xf32> to vector<8x4xbf16>
    %c0_5 = arith.constant 0 : index
    %c0_6 = arith.constant 0 : index
    %15 = vector.load %arg7[%c0_5, %c0_6] : memref<8x32xbf16, #tpu.memory_space<vmem>>, vector<8x4xbf16>
    %c0_7 = arith.constant 0 : index
    %c0_8 = arith.constant 0 : index
    %16 = vector.load %arg8[%c0_7, %c0_8] : memref<8x32xbf16, #tpu.memory_space<vmem>>, vector<8x4xbf16>
    %cst_9 = arith.constant dense<0.000000e+00> : vector<8x8xf32>
    %17 = tpu.matmul %14, %15, %cst_9 {dimension_numbers = #tpu.dot_dimension_numbers<[1], [1], [0], [0], [0, 0, 1, 0], [], []>} : vector<8x4xbf16>, vector<8x4xbf16>, vector<8x8xf32> -> vector<8x8xf32>
    %cst_10 = arith.constant dense<0xFF800000> : vector<8xf32>
    %18 = vector.multi_reduction <maximumf>, %17, %cst_10 [1] : vector<8x8xf32> to vector<8xf32>
    %19 = vector.shape_cast %18 : vector<8xf32> to vector<8x1xf32>
    %20 = vector.broadcast %19 : vector<8x1xf32> to vector<8x8xf32>
    %21 = arith.subf %17, %20 : vector<8x8xf32>
    %22 = math.exp %21 : vector<8x8xf32>
    %cst_11 = arith.constant dense<0.000000e+00> : vector<8xf32>
    %23 = vector.multi_reduction <add>, %22, %cst_11 [1] : vector<8x8xf32> to vector<8xf32>
    %24 = vector.shape_cast %23 : vector<8xf32> to vector<8x1xf32>
    %25 = tpu.reciprocal %24 {approx = true} : vector<8x1xf32> -> vector<8x1xf32>
    %26 = arith.truncf %22 : vector<8x8xf32> to vector<8x8xbf16>
    %cst_12 = arith.constant dense<0.000000e+00> : vector<8x4xf32>
    %27 = tpu.matmul %26, %16, %cst_12 {dimension_numbers = #tpu.dot_dimension_numbers<[1], [0], [0], [1], [0, 0, 1, 1], [], []>} : vector<8x8xbf16>, vector<8x4xbf16>, vector<8x4xf32> -> vector<8x4xf32>
    %28 = vector.broadcast %25 : vector<8x1xf32> to vector<8x4xf32>
    %29 = arith.mulf %27, %28 : vector<8x4xf32>
    %c0_13 = arith.constant 0 : index
    %c0_14 = arith.constant 0 : index
    %30 = vector.load %arg9[%c0_13, %c0_14] : memref<8x32xf32, #tpu.memory_space<vmem>>, vector<8x4xf32>
    tpu.vector_store %arg9[%c0_13, %c0_14], %29 {strides = array<i32>} : memref<8x32xf32, #tpu.memory_space<vmem>>, vector<8x4xf32>,
    %31 = vector.extract_strided_slice %12 {offsets = [0, 4], sizes = [8, 4], strides = [1, 1]} : vector<8x32xf32> to vector<8x4xf32>
    %32 = arith.truncf %31 : vector<8x4xf32> to vector<8x4xbf16>
    %c0_15 = arith.constant 0 : index
    %c4 = arith.constant 4 : index
    %33 = vector.load %arg7[%c0_15, %c4] : memref<8x32xbf16, #tpu.memory_space<vmem>>, vector<8x4xbf16>
    %c0_16 = arith.constant 0 : index
    %c4_17 = arith.constant 4 : index
    %34 = vector.load %arg8[%c0_16, %c4_17] : memref<8x32xbf16, #tpu.memory_space<vmem>>, vector<8x4xbf16>
    %cst_18 = arith.constant dense<0.000000e+00> : vector<8x8xf32>
    %35 = tpu.matmul %32, %33, %cst_18 {dimension_numbers = #tpu.dot_dimension_numbers<[1], [1], [0], [0], [0, 0, 1, 0], [], []>} : vector<8x4xbf16>, vector<8x4xbf16>, vector<8x8xf32> -> vector<8x8xf32>
    %cst_19 = arith.constant dense<0xFF800000> : vector<8xf32>
    %36 = vector.multi_reduction <maximumf>, %35, %cst_19 [1] : vector<8x8xf32> to vector<8xf32>
    %37 = vector.shape_cast %36 : vector<8xf32> to vector<8x1xf32>
    %38 = vector.broadcast %37 : vector<8x1xf32> to vector<8x8xf32>
    %39 = arith.subf %35, %38 : vector<8x8xf32>
    %40 = math.exp %39 : vector<8x8xf32>
    %cst_20 = arith.constant dense<0.000000e+00> : vector<8xf32>
    %41 = vector.multi_reduction <add>, %40, %cst_20 [1] : vector<8x8xf32> to vector<8xf32>
    %42 = vector.shape_cast %41 : vector<8xf32> to vector<8x1xf32>
    %43 = tpu.reciprocal %42 {approx = true} : vector<8x1xf32> -> vector<8x1xf32>
    %44 = arith.truncf %40 : vector<8x8xf32> to vector<8x8xbf16>
    %cst_21 = arith.constant dense<0.000000e+00> : vector<8x4xf32>
    %45 = tpu.matmul %44, %34, %cst_21 {dimension_numbers = #tpu.dot_dimension_numbers<[1], [0], [0], [1], [0, 0, 1, 1], [], []>} : vector<8x8xbf16>, vector<8x4xbf16>, vector<8x4xf32> -> vector<8x4xf32>
    %46 = vector.broadcast %43 : vector<8x1xf32> to vector<8x4xf32>
    %47 = arith.mulf %45, %46 : vector<8x4xf32>
    %c0_22 = arith.constant 0 : index
    %c4_23 = arith.constant 4 : index
    %48 = vector.load %arg9[%c0_22, %c4_23] : memref<8x32xf32, #tpu.memory_space<vmem>>, vector<8x4xf32>
    tpu.vector_store %arg9[%c0_22, %c4_23], %47 {strides = array<i32>} : memref<8x32xf32, #tpu.memory_space<vmem>>, vector<8x4xf32>,
    %49 = vector.extract_strided_slice %12 {offsets = [0, 8], sizes = [8, 4], strides = [1, 1]} : vector<8x32xf32> to vector<8x4xf32>
    %50 = arith.truncf %49 : vector<8x4xf32> to vector<8x4xbf16>
    %c0_24 = arith.constant 0 : index
    %c8 = arith.constant 8 : index
    %51 = vector.load %arg7[%c0_24, %c8] : memref<8x32xbf16, #tpu.memory_space<vmem>>, vector<8x4xbf16>
    %c0_25 = arith.constant 0 : index
    %c8_26 = arith.constant 8 : index
    %52 = vector.load %arg8[%c0_25, %c8_26] : memref<8x32xbf16, #tpu.memory_space<vmem>>, vector<8x4xbf16>
    %cst_27 = arith.constant dense<0.000000e+00> : vector<8x8xf32>
    %53 = tpu.matmul %50, %51, %cst_27 {dimension_numbers = #tpu.dot_dimension_numbers<[1], [1], [0], [0], [0, 0, 1, 0], [], []>} : vector<8x4xbf16>, vector<8x4xbf16>, vector<8x8xf32> -> vector<8x8xf32>
    %cst_28 = arith.constant dense<0xFF800000> : vector<8xf32>
    %54 = vector.multi_reduction <maximumf>, %53, %cst_28 [1] : vector<8x8xf32> to vector<8xf32>
    %55 = vector.shape_cast %54 : vector<8xf32> to vector<8x1xf32>
    %56 = vector.broadcast %55 : vector<8x1xf32> to vector<8x8xf32>
    %57 = arith.subf %53, %56 : vector<8x8xf32>
    %58 = math.exp %57 : vector<8x8xf32>
    %cst_29 = arith.constant dense<0.000000e+00> : vector<8xf32>
    %59 = vector.multi_reduction <add>, %58, %cst_29 [1] : vector<8x8xf32> to vector<8xf32>
    %60 = vector.shape_cast %59 : vector<8xf32> to vector<8x1xf32>
    %61 = tpu.reciprocal %60 {approx = true} : vector<8x1xf32> -> vector<8x1xf32>
    %62 = arith.truncf %58 : vector<8x8xf32> to vector<8x8xbf16>
    %cst_30 = arith.constant dense<0.000000e+00> : vector<8x4xf32>
    %63 = tpu.matmul %62, %52, %cst_30 {dimension_numbers = #tpu.dot_dimension_numbers<[1], [0], [0], [1], [0, 0, 1, 1], [], []>} : vector<8x8xbf16>, vector<8x4xbf16>, vector<8x4xf32> -> vector<8x4xf32>
    %64 = vector.broadcast %61 : vector<8x1xf32> to vector<8x4xf32>
    %65 = arith.mulf %63, %64 : vector<8x4xf32>
    %c0_31 = arith.constant 0 : index
    %c8_32 = arith.constant 8 : index
    %66 = vector.load %arg9[%c0_31, %c8_32] : memref<8x32xf32, #tpu.memory_space<vmem>>, vector<8x4xf32>
    tpu.vector_store %arg9[%c0_31, %c8_32], %65 {strides = array<i32>} : memref<8x32xf32, #tpu.memory_space<vmem>>, vector<8x4xf32>,
    %67 = vector.extract_strided_slice %12 {offsets = [0, 12], sizes = [8, 4], strides = [1, 1]} : vector<8x32xf32> to vector<8x4xf32>
    %68 = arith.truncf %67 : vector<8x4xf32> to vector<8x4xbf16>
    %c0_33 = arith.constant 0 : index
    %c12 = arith.constant 12 : index
    %69 = vector.load %arg7[%c0_33, %c12] : memref<8x32xbf16, #tpu.memory_space<vmem>>, vector<8x4xbf16>
    %c0_34 = arith.constant 0 : index
    %c12_35 = arith.constant 12 : index
    %70 = vector.load %arg8[%c0_34, %c12_35] : memref<8x32xbf16, #tpu.memory_space<vmem>>, vector<8x4xbf16>
    %cst_36 = arith.constant dense<0.000000e+00> : vector<8x8xf32>
    %71 = tpu.matmul %68, %69, %cst_36 {dimension_numbers = #tpu.dot_dimension_numbers<[1], [1], [0], [0], [0, 0, 1, 0], [], []>} : vector<8x4xbf16>, vector<8x4xbf16>, vector<8x8xf32> -> vector<8x8xf32>
    %cst_37 = arith.constant dense<0xFF800000> : vector<8xf32>
    %72 = vector.multi_reduction <maximumf>, %71, %cst_37 [1] : vector<8x8xf32> to vector<8xf32>
    %73 = vector.shape_cast %72 : vector<8xf32> to vector<8x1xf32>
    %74 = vector.broadcast %73 : vector<8x1xf32> to vector<8x8xf32>
    %75 = arith.subf %71, %74 : vector<8x8xf32>
    %76 = math.exp %75 : vector<8x8xf32>
    %cst_38 = arith.constant dense<0.000000e+00> : vector<8xf32>
    %77 = vector.multi_reduction <add>, %76, %cst_38 [1] : vector<8x8xf32> to vector<8xf32>
    %78 = vector.shape_cast %77 : vector<8xf32> to vector<8x1xf32>
    %79 = tpu.reciprocal %78 {approx = true} : vector<8x1xf32> -> vector<8x1xf32>
    %80 = arith.truncf %76 : vector<8x8xf32> to vector<8x8xbf16>
    %cst_39 = arith.constant dense<0.000000e+00> : vector<8x4xf32>
    %81 = tpu.matmul %80, %70, %cst_39 {dimension_numbers = #tpu.dot_dimension_numbers<[1], [0], [0], [1], [0, 0, 1, 1], [], []>} : vector<8x8xbf16>, vector<8x4xbf16>, vector<8x4xf32> -> vector<8x4xf32>
    %82 = vector.broadcast %79 : vector<8x1xf32> to vector<8x4xf32>
    %83 = arith.mulf %81, %82 : vector<8x4xf32>
    %c0_40 = arith.constant 0 : index
    %c12_41 = arith.constant 12 : index
    %84 = vector.load %arg9[%c0_40, %c12_41] : memref<8x32xf32, #tpu.memory_space<vmem>>, vector<8x4xf32>
    tpu.vector_store %arg9[%c0_40, %c12_41], %83 {strides = array<i32>} : memref<8x32xf32, #tpu.memory_space<vmem>>, vector<8x4xf32>,
    %85 = vector.extract_strided_slice %12 {offsets = [0, 16], sizes = [8, 4], strides = [1, 1]} : vector<8x32xf32> to vector<8x4xf32>
    %86 = arith.truncf %85 : vector<8x4xf32> to vector<8x4xbf16>
    %c0_42 = arith.constant 0 : index
    %c16 = arith.constant 16 : index
    %87 = vector.load %arg7[%c0_42, %c16] : memref<8x32xbf16, #tpu.memory_space<vmem>>, vector<8x4xbf16>
    %c0_43 = arith.constant 0 : index
    %c16_44 = arith.constant 16 : index
    %88 = vector.load %arg8[%c0_43, %c16_44] : memref<8x32xbf16, #tpu.memory_space<vmem>>, vector<8x4xbf16>
    %cst_45 = arith.constant dense<0.000000e+00> : vector<8x8xf32>
    %89 = tpu.matmul %86, %87, %cst_45 {dimension_numbers = #tpu.dot_dimension_numbers<[1], [1], [0], [0], [0, 0, 1, 0], [], []>} : vector<8x4xbf16>, vector<8x4xbf16>, vector<8x8xf32> -> vector<8x8xf32>
    %cst_46 = arith.constant dense<0xFF800000> : vector<8xf32>
    %90 = vector.multi_reduction <maximumf>, %89, %cst_46 [1] : vector<8x8xf32> to vector<8xf32>
    %91 = vector.shape_cast %90 : vector<8xf32> to vector<8x1xf32>
    %92 = vector.broadcast %91 : vector<8x1xf32> to vector<8x8xf32>
    %93 = arith.subf %89, %92 : vector<8x8xf32>
    %94 = math.exp %93 : vector<8x8xf32>
    %cst_47 = arith.constant dense<0.000000e+00> : vector<8xf32>
    %95 = vector.multi_reduction <add>, %94, %cst_47 [1] : vector<8x8xf32> to vector<8xf32>
    %96 = vector.shape_cast %95 : vector<8xf32> to vector<8x1xf32>
    %97 = tpu.reciprocal %96 {approx = true} : vector<8x1xf32> -> vector<8x1xf32>
    %98 = arith.truncf %94 : vector<8x8xf32> to vector<8x8xbf16>
    %cst_48 = arith.constant dense<0.000000e+00> : vector<8x4xf32>
    %99 = tpu.matmul %98, %88, %cst_48 {dimension_numbers = #tpu.dot_dimension_numbers<[1], [0], [0], [1], [0, 0, 1, 1], [], []>} : vector<8x8xbf16>, vector<8x4xbf16>, vector<8x4xf32> -> vector<8x4xf32>
    %100 = vector.broadcast %97 : vector<8x1xf32> to vector<8x4xf32>
    %101 = arith.mulf %99, %100 : vector<8x4xf32>
    %c0_49 = arith.constant 0 : index
    %c16_50 = arith.constant 16 : index
    %102 = vector.load %arg9[%c0_49, %c16_50] : memref<8x32xf32, #tpu.memory_space<vmem>>, vector<8x4xf32>
    tpu.vector_store %arg9[%c0_49, %c16_50], %101 {strides = array<i32>} : memref<8x32xf32, #tpu.memory_space<vmem>>, vector<8x4xf32>,
    %103 = vector.extract_strided_slice %12 {offsets = [0, 20], sizes = [8, 4], strides = [1, 1]} : vector<8x32xf32> to vector<8x4xf32>
    %104 = arith.truncf %103 : vector<8x4xf32> to vector<8x4xbf16>
    %c0_51 = arith.constant 0 : index
    %c20 = arith.constant 20 : index
    %105 = vector.load %arg7[%c0_51, %c20] : memref<8x32xbf16, #tpu.memory_space<vmem>>, vector<8x4xbf16>
    %c0_52 = arith.constant 0 : index
    %c20_53 = arith.constant 20 : index
    %106 = vector.load %arg8[%c0_52, %c20_53] : memref<8x32xbf16, #tpu.memory_space<vmem>>, vector<8x4xbf16>
    %cst_54 = arith.constant dense<0.000000e+00> : vector<8x8xf32>
    %107 = tpu.matmul %104, %105, %cst_54 {dimension_numbers = #tpu.dot_dimension_numbers<[1], [1], [0], [0], [0, 0, 1, 0], [], []>} : vector<8x4xbf16>, vector<8x4xbf16>, vector<8x8xf32> -> vector<8x8xf32>
    %cst_55 = arith.constant dense<0xFF800000> : vector<8xf32>
    %108 = vector.multi_reduction <maximumf>, %107, %cst_55 [1] : vector<8x8xf32> to vector<8xf32>
    %109 = vector.shape_cast %108 : vector<8xf32> to vector<8x1xf32>
    %110 = vector.broadcast %109 : vector<8x1xf32> to vector<8x8xf32>
    %111 = arith.subf %107, %110 : vector<8x8xf32>
    %112 = math.exp %111 : vector<8x8xf32>
    %cst_56 = arith.constant dense<0.000000e+00> : vector<8xf32>
    %113 = vector.multi_reduction <add>, %112, %cst_56 [1] : vector<8x8xf32> to vector<8xf32>
    %114 = vector.shape_cast %113 : vector<8xf32> to vector<8x1xf32>
    %115 = tpu.reciprocal %114 {approx = true} : vector<8x1xf32> -> vector<8x1xf32>
    %116 = arith.truncf %112 : vector<8x8xf32> to vector<8x8xbf16>
    %cst_57 = arith.constant dense<0.000000e+00> : vector<8x4xf32>
    %117 = tpu.matmul %116, %106, %cst_57 {dimension_numbers = #tpu.dot_dimension_numbers<[1], [0], [0], [1], [0, 0, 1, 1], [], []>} : vector<8x8xbf16>, vector<8x4xbf16>, vector<8x4xf32> -> vector<8x4xf32>
    %118 = vector.broadcast %115 : vector<8x1xf32> to vector<8x4xf32>
    %119 = arith.mulf %117, %118 : vector<8x4xf32>
    %c0_58 = arith.constant 0 : index
    %c20_59 = arith.constant 20 : index
    %120 = vector.load %arg9[%c0_58, %c20_59] : memref<8x32xf32, #tpu.memory_space<vmem>>, vector<8x4xf32>
    tpu.vector_store %arg9[%c0_58, %c20_59], %119 {strides = array<i32>} : memref<8x32xf32, #tpu.memory_space<vmem>>, vector<8x4xf32>,
    %121 = vector.extract_strided_slice %12 {offsets = [0, 24], sizes = [8, 4], strides = [1, 1]} : vector<8x32xf32> to vector<8x4xf32>
    %122 = arith.truncf %121 : vector<8x4xf32> to vector<8x4xbf16>
    %c0_60 = arith.constant 0 : index
    %c24 = arith.constant 24 : index
    %123 = vector.load %arg7[%c0_60, %c24] : memref<8x32xbf16, #tpu.memory_space<vmem>>, vector<8x4xbf16>
    %c0_61 = arith.constant 0 : index
    %c24_62 = arith.constant 24 : index
    %124 = vector.load %arg8[%c0_61, %c24_62] : memref<8x32xbf16, #tpu.memory_space<vmem>>, vector<8x4xbf16>
    %cst_63 = arith.constant dense<0.000000e+00> : vector<8x8xf32>
    %125 = tpu.matmul %122, %123, %cst_63 {dimension_numbers = #tpu.dot_dimension_numbers<[1], [1], [0], [0], [0, 0, 1, 0], [], []>} : vector<8x4xbf16>, vector<8x4xbf16>, vector<8x8xf32> -> vector<8x8xf32>
    %cst_64 = arith.constant dense<0xFF800000> : vector<8xf32>
    %126 = vector.multi_reduction <maximumf>, %125, %cst_64 [1] : vector<8x8xf32> to vector<8xf32>
    %127 = vector.shape_cast %126 : vector<8xf32> to vector<8x1xf32>
    %128 = vector.broadcast %127 : vector<8x1xf32> to vector<8x8xf32>
    %129 = arith.subf %125, %128 : vector<8x8xf32>
    %130 = math.exp %129 : vector<8x8xf32>
    %cst_65 = arith.constant dense<0.000000e+00> : vector<8xf32>
    %131 = vector.multi_reduction <add>, %130, %cst_65 [1] : vector<8x8xf32> to vector<8xf32>
    %132 = vector.shape_cast %131 : vector<8xf32> to vector<8x1xf32>
    %133 = tpu.reciprocal %132 {approx = true} : vector<8x1xf32> -> vector<8x1xf32>
    %134 = arith.truncf %130 : vector<8x8xf32> to vector<8x8xbf16>
    %cst_66 = arith.constant dense<0.000000e+00> : vector<8x4xf32>
    %135 = tpu.matmul %134, %124, %cst_66 {dimension_numbers = #tpu.dot_dimension_numbers<[1], [0], [0], [1], [0, 0, 1, 1], [], []>} : vector<8x8xbf16>, vector<8x4xbf16>, vector<8x4xf32> -> vector<8x4xf32>
    %136 = vector.broadcast %133 : vector<8x1xf32> to vector<8x4xf32>
    %137 = arith.mulf %135, %136 : vector<8x4xf32>
    %c0_67 = arith.constant 0 : index
    %c24_68 = arith.constant 24 : index
    %138 = vector.load %arg9[%c0_67, %c24_68] : memref<8x32xf32, #tpu.memory_space<vmem>>, vector<8x4xf32>
    tpu.vector_store %arg9[%c0_67, %c24_68], %137 {strides = array<i32>} : memref<8x32xf32, #tpu.memory_space<vmem>>, vector<8x4xf32>,
    %139 = vector.extract_strided_slice %12 {offsets = [0, 28], sizes = [8, 4], strides = [1, 1]} : vector<8x32xf32> to vector<8x4xf32>
    %140 = arith.truncf %139 : vector<8x4xf32> to vector<8x4xbf16>
    %c0_69 = arith.constant 0 : index
    %c28 = arith.constant 28 : index
    %141 = vector.load %arg7[%c0_69, %c28] : memref<8x32xbf16, #tpu.memory_space<vmem>>, vector<8x4xbf16>
    %c0_70 = arith.constant 0 : index
    %c28_71 = arith.constant 28 : index
    %142 = vector.load %arg8[%c0_70, %c28_71] : memref<8x32xbf16, #tpu.memory_space<vmem>>, vector<8x4xbf16>
    %cst_72 = arith.constant dense<0.000000e+00> : vector<8x8xf32>
    %143 = tpu.matmul %140, %141, %cst_72 {dimension_numbers = #tpu.dot_dimension_numbers<[1], [1], [0], [0], [0, 0, 1, 0], [], []>} : vector<8x4xbf16>, vector<8x4xbf16>, vector<8x8xf32> -> vector<8x8xf32>
    %cst_73 = arith.constant dense<0xFF800000> : vector<8xf32>
    %144 = vector.multi_reduction <maximumf>, %143, %cst_73 [1] : vector<8x8xf32> to vector<8xf32>
    %145 = vector.shape_cast %144 : vector<8xf32> to vector<8x1xf32>
    %146 = vector.broadcast %145 : vector<8x1xf32> to vector<8x8xf32>
    %147 = arith.subf %143, %146 : vector<8x8xf32>
    %148 = math.exp %147 : vector<8x8xf32>
    %cst_74 = arith.constant dense<0.000000e+00> : vector<8xf32>
    %149 = vector.multi_reduction <add>, %148, %cst_74 [1] : vector<8x8xf32> to vector<8xf32>
    %150 = vector.shape_cast %149 : vector<8xf32> to vector<8x1xf32>
    %151 = tpu.reciprocal %150 {approx = true} : vector<8x1xf32> -> vector<8x1xf32>
    %152 = arith.truncf %148 : vector<8x8xf32> to vector<8x8xbf16>
    %cst_75 = arith.constant dense<0.000000e+00> : vector<8x4xf32>
    %153 = tpu.matmul %152, %142, %cst_75 {dimension_numbers = #tpu.dot_dimension_numbers<[1], [0], [0], [1], [0, 0, 1, 1], [], []>} : vector<8x8xbf16>, vector<8x4xbf16>, vector<8x4xf32> -> vector<8x4xf32>
    %154 = vector.broadcast %151 : vector<8x1xf32> to vector<8x4xf32>
    %155 = arith.mulf %153, %154 : vector<8x4xf32>
    %c0_76 = arith.constant 0 : index
    %c28_77 = arith.constant 28 : index
    %156 = vector.load %arg9[%c0_76, %c28_77] : memref<8x32xf32, #tpu.memory_space<vmem>>, vector<8x4xf32>
    tpu.vector_store %arg9[%c0_76, %c28_77], %155 {strides = array<i32>} : memref<8x32xf32, #tpu.memory_space<vmem>>, vector<8x4xf32>,
    %c0_78 = arith.constant 0 : index
    %c0_79 = arith.constant 0 : index
    %157 = vector.load %arg9[%c0_78, %c0_79] : memref<8x32xf32, #tpu.memory_space<vmem>>, vector<8x32xf32>
    %158 = arith.truncf %157 : vector<8x32xf32> to vector<8x32xbf16>
    %c0_80 = arith.constant 0 : index
    %c0_81 = arith.constant 0 : index
    %159 = vector.load %arg4[%c0_80, %c0_81] : memref<32x32xbf16, #tpu.memory_space<vmem>>, vector<32x32xbf16>
    %cst_82 = arith.constant dense<0.000000e+00> : vector<8x32xf32>
    %160 = tpu.matmul %158, %159, %cst_82 {dimension_numbers = #tpu.dot_dimension_numbers<[1], [0], [0], [1], [0, 0, 1, 1], [], []>} : vector<8x32xbf16>, vector<32x32xbf16>, vector<8x32xf32> -> vector<8x32xf32>
    %c0_83 = arith.constant 0 : index
    %c0_84 = arith.constant 0 : index
    %161 = vector.load %arg5[%c0_83, %c0_84] : memref<1x32xf32, #tpu.memory_space<vmem>>, vector<1x32xf32>
    %162 = vector.broadcast %161 : vector<1x32xf32> to vector<8x32xf32>
    %163 = arith.addf %160, %162 : vector<8x32xf32>
    %c0_85 = arith.constant 0 : index
    %c0_86 = arith.constant 0 : index
    %c0_87 = arith.constant 0 : index
    %164 = vector.load %arg6[%c0_85, %c0_86, %c0_87] : memref<1x8x32xf32, #tpu.memory_space<vmem>>, vector<1x8x32xf32>
    %165 = vector.shape_cast %164 : vector<1x8x32xf32> to vector<8x32xf32>
    %166 = vector.shape_cast %163 : vector<8x32xf32> to vector<1x8x32xf32>
    tpu.vector_store %arg6[%c0_85, %c0_86, %c0_87], %166 {strides = array<i32>} : memref<1x8x32xf32, #tpu.memory_space<vmem>>, vector<1x8x32xf32>,
    return
  }
  func.func @transform_0(%arg0: i32, %arg1: i32) -> (i32, i32, i32) {
    %c0_i32 = arith.constant 0 : i32
    %c0_i32_0 = arith.constant 0 : i32
    %c0_i32_1 = arith.constant 0 : i32
    return %arg0, %c0_i32, %c0_i32_0 : i32, i32, i32
  }
  func.func @transform_1(%arg0: i32, %arg1: i32) -> (i32, i32) {
    %c0_i32 = arith.constant 0 : i32
    %c0_i32_0 = arith.constant 0 : i32
    %c0_i32_1 = arith.constant 0 : i32
    return %c0_i32, %c0_i32_0 : i32, i32
  }
  func.func @transform_2(%arg0: i32, %arg1: i32) -> (i32, i32) {
    %c0_i32 = arith.constant 0 : i32
    %c0_i32_0 = arith.constant 0 : i32
    %c0_i32_1 = arith.constant 0 : i32
    return %c0_i32, %c0_i32_0 : i32, i32
  }
  func.func @transform_3(%arg0: i32, %arg1: i32) -> (i32, i32) {
    %c0_i32 = arith.constant 0 : i32
    %c0_i32_0 = arith.constant 0 : i32
    %c0_i32_1 = arith.constant 0 : i32
    return %c0_i32, %c0_i32_0 : i32, i32
  }
  func.func @transform_4(%arg0: i32, %arg1: i32) -> (i32, i32, i32) {
    %c0_i32 = arith.constant 0 : i32
    %c0_i32_0 = arith.constant 0 : i32
    return %arg0, %arg1, %c0_i32 : i32, i32, i32
  }
}

</mosaic_0001>

<bundles_post_ra>
// kernel: tpu_custom_call.1
= control target key start
LH: loop header
LB: loop body
LE: loop exit
PB: predicated region body
PF: predicated region fallthrough
CT: control target
= control target key end

     0   :  { %9 = vsyncpa [#allocation6], 0  ;;  %s2519_s0 = inlined_call_operand.hbm [shape: f32[2,8,32], index: 0, kind: input, shape index: {}]   ;;  %s2520_s1 = inlined_call_operand.hbm [shape: bf16[32,96], index: 1, kind: input, shape index: {}]   ;;  %s2521_s2 = inlined_call_operand.hbm [shape: bf16[32,32], index: 2, kind: input, shape index: {}]   ;;  %s2522_s3 = inlined_call_operand.vmem [shape: f32[1,32], index: 3, kind: input, shape index: {}]   ;;  %s2523_s4 = inlined_call_operand.hbm [shape: f32[2,8,32], index: 4, kind: output, shape index: {}]  }
   0x1   :  { %11 = vsyncpa [#allocation6 + $0x1], 0 }
   0x2   :  { %12 = vsyncpa [#allocation9], 0 }
   0x3   :  { %13 = vsyncpa [#allocation7], 0 }
   0x4   :  { %15 = vsyncpa [#allocation7 + $0x1], 0  ;;  %s2154_s15 = smov 0   ;;  %s2156_s16 = smov 0  }
   0x5   :  { %s2158_s17 = smov 0   ;;  %s2160_s18 = smov 0  }
   0x6   :  { %s2162_s19 = smov 0   ;;  %s2164_s20 = smov 0  }
   0x7 LB: > { %s1566_s21 = sadd.s32 4294967295, %s2104_s20   ;;  %s1567_s22 = sadd.s32 4294967294, %s2104_s20   ;;  %s2104_s20 = sphi %s2164_s20, %s21_s20   ;;  %s2100_s19 = sphi %s2162_s19, %s2543_s19   ;;  %s2096_s18 = sphi %s2160_s18, %s2542_s18   ;;  %s2092_s17 = sphi %s2158_s17, %s2541_s17   ;;  %s2088_s16 = sphi %s2156_s16, %s2540_s16   ;;  %s2084_s15 = sphi %s2154_s15, %s2539_s15  }
   0x8   : > { %p53_p0 = scmp.ne.s32.totalorder %s2088_s16, %s2084_s15  ;;  %p2188_p1 = scmp.eq.s32.totalorder %s1566_s21, 0 }
   0x9   : > { %p2192_p2 = scmp.eq.s32.totalorder %s1566_s21, 1  ;;  %p148_p3 = scmp.eq.s32.totalorder %s1567_s22, 1 }
   0xa   : > { %s2527_s23 = scalar_select %p2188_p1, 1, 0 }
   0xb   : > { %p2198_p4 = por %p2188_p1, %p53_p0  ;;  %p1568_p5 = scmp.ge.s32.totalorder %s2104_s20, 1 }
   0xc   : > { %p2203_p6 = por %p148_p3, %p53_p0  ;;  %p155_p7 = scmp.lt.s32.totalorder %s2104_s20, 3 }
   0xd   : > { %s2529_s25 = scalar_select %p2198_p4, 1, 0 }
   0xe   : > { %s2530_s26 = scalar_select %p2203_p6, 1, 0 }
   0xf   : > { %p2208_p8 = pnand %p1568_p5, %p155_p7  ;;  %s2106_s28 = smov [#allocation8]  }
  0x10   : > { %s167_s29 = sshll.u32 %s2106_s28, 4  ;;  %s2107_s5 = smov [#allocation10]   ;;  %s168_s29 = int_to_ptr.vmem [resolvable:$true] %s167_s29 }
  0x11   : > { %p1798_p9 = pneg %p2208_p8  ;;  %s180_s6 = sshll.u32 %s2107_s5, 4  ;;  %s181_s6 = int_to_ptr.vmem [resolvable:$true] %s180_s6 }
  0x12   : > { %s1951_s7 = scalar_lea.vmem %s168_s29, 256  ;;  %p1959_p5 = scmp.lt.s32.totalorder %s168_s29, %s168_s29 }
  0x13   : > { %p2217_p11 = pnand %p1798_p9, %p2188_p1  ;;  %p1952_p13 = scmp.ne.s32.totalorder %s168_s29, %s1951_s7 }
  0x14   : > { %p1960_p7 = scmp.lt.s32.totalorder %s1951_s7, %s1951_s7 }
  0x15   : > { %p1942_p12 = pneg %p2217_p11 }
  0x16   : > { %p1961_p10 = por %p1960_p7, %p1959_p5 }
  0x17   : > { %p1954_p0 = pnand %p1952_p13, %p1942_p12 }
  0x19   : > { %p1955_p3 = pneg %p1954_p0 }
  0x1b   : > { %p1962_p9 = pnand %p1961_p10, %p1955_p3 }
  0x1d   : > { %1965 = shalt.err (!%p1962_p9)
}
  0x1e   : > { %s2108_s8 = smov 64   ;;  %s2109_s9 = smov 4  }
  0x1f   : > { %1801 = dma.hbm_to_vmem [thread:$0]  (!%p2217_p11), %s2520_s1, 256, %s168_s29, [#allocation9], %s2108_s8, %s2108_s8, %s2109_s9  }
  0x20   : > { %s1977_s12 = scalar_lea.vmem %s181_s6, 256  ;;  %p1985_p1 = scmp.lt.s32.totalorder %s181_s6, %s181_s6 }
  0x21   : > { %p1978_p6 = scmp.ne.s32.totalorder %s181_s6, %s1977_s12  ;;  %p1986_p4 = scmp.lt.s32.totalorder %s1977_s12, %s1977_s12 }
  0x23   : > { %p1980_p13 = pnand %p1978_p6, %p1942_p12  ;;  %p1987_p5 = por %p1986_p4, %p1985_p1 }
  0x25   : > { %p1981_p0 = pneg %p1980_p13 }
  0x27   : > { %p1988_p10 = pnand %p1987_p5, %p1981_p0 }
  0x29   : > { %1991 = shalt.err (!%p1988_p10)
}
  0x2a   : > { %1804 = dma.hbm_to_vmem [thread:$0]  (!%p2217_p11), %s2521_s2, 256, %s181_s6, [#allocation9], %s2108_s8, %s2108_s8, %s2109_s9  }
  0x2b   : > { %s33_s21 = sadd.s32 1, %s2100_s19  ;;  %s40_s22 = sadd.s32 1, %s2092_s17 }
  0x2c   : > { %p35_p1 = scmp.ge.s32.totalorder %s33_s21, 2  ;;  %p47_p4 = scmp.ne.s32.totalorder %s2092_s17, %s2088_s16 }
  0x2d   : > { %p48_p6 = scmp.eq.s32.totalorder %s2104_s20, 0  ;;  %p1815_p12 = scmp.lt.s32.totalorder %s2104_s20, 2 }
  0x2e   : > { %s2545_s21 = smov (%p35_p1, %s33_s21), 0  ;;  %p2249_p7 = por %p2192_p2, %p47_p4 }
  0x2f   : > { %p49_p3 = por %p48_p6, %p47_p4  ;;  %s37_s29 = ssub.s32 %s2100_s19, %s2545_s21 }
  0x30   : > { %s197_s30 = sand.u32 1, %s2092_s17   ;;  %p38_p9 = scmp.eq.s32.totalorder %s37_s29, 0 }
  0x31   : > { %s1572_s5 = sshll.u32 %s197_s30, 3  ;;  %s1573_s6 = sshll.u32 %s2100_s19, 7 }
  0x32   : > { %s2258_s7 = scalar_select %p38_p9, %s2092_s17, %s40_s22  }
  0x33   : > { %s206_s10 = scalar_lea.hbm %s2519_s0, %s1573_s6  ;;  %s201_s11 = scalar_lea.vmem [#allocation5], %s1572_s5 }
  0x34   : > { %s208_s12 = sshll.u32 %s201_s11, 4  ;;  %p2265_p11 = pnand %p1815_p12, %p49_p3  ;;  %s209_s12 = int_to_ptr.vmem [resolvable:$true] %s208_s12 }
  0x35   : > { %s198_s13 = scalar_lea.sflag [#allocation6], %s197_s30  ;;  %s2005_s14 = scalar_lea.vmem %s209_s12, 128 }
  0x36   : > { %p1994_p2 = pneg %p2265_p11  ;;  %p2006_p13 = scmp.ne.s32.totalorder %s209_s12, %s2005_s14 }
  0x37   : > { %s2110_s22 = smov [#allocation5]  }
  0x38   : > { %p2008_p0 = pnand %p2006_p13, %p1994_p2  ;;  %s2010_s29 = sshll.u32 %s2110_s22, 4  ;;  %s2011_s29 = int_to_ptr.vmem [resolvable:$false] %s2010_s29 }
  0x39   : > { %s2012_s6 = scalar_lea.vmem %s2011_s29, 256  ;;  %p2013_p10 = scmp.lt.s32.totalorder %s209_s12, %s2011_s29 }
  0x3a   : > { %p2009_p5 = pneg %p2008_p0  ;;  %p2014_p1 = scmp.lt.s32.totalorder %s2012_s6, %s2005_s14 }
  0x3c   : > { %p2015_p4 = por %p2014_p1, %p2013_p10 }
  0x3e   : > { %p2016_p6 = pnand %p2015_p4, %p2009_p5 }
  0x40   : > { %2019 = shalt.err (!%p2016_p6)
}
  0x41   : > { %1808 = dma.hbm_to_vmem [thread:$0]  (!%p2265_p11), %s206_s10, 128, %s209_s12, %s198_s13  }
  0x42   : > { %217 = sbr.rel (%p2208_p8) target bundleno = 1494 (0x5d6), region = 36  ;;  %s2276_s30 = sand.u32 (!%p2208_p8), 1, %s2088_s16  }
  0x43   : > { %s1575_s5 = sshll.u32 (!%p2208_p8), %s2276_s30, 3  ;;  %s220_s8 = scalar_lea.sflag (!%p2208_p8), [#allocation6], %s2276_s30 }
  0x44   : > { %s223_s9 = scalar_lea.vmem (!%p2208_p8), [#allocation5], %s1575_s5  ;;  %p2535_p12 = scmp.ne.s32.totalorder (!%p2208_p8), %s2529_s25, 0 }
  0x47   : > { %2071 = dma.done.wait (%p2535_p12), %s220_s8, 128  }
  0x48   : > { %2073 = vsyncadd (%p2535_p12), %s220_s8, 4294967168  ;;  %p2536_p3 = scmp.ne.s32.totalorder %s2527_s23, 0 }
  0x4a   : > { %2075 = dma.done.wait (%p2536_p3), [#allocation9], 512  }
  0x4b   : > { %2077 = vsyncadd (%p2536_p3), [#allocation9], 4294966784  ;;  %v2111_v0 = vmov 0.0   ;;  %vm2112_vm0 = vmmov 0   ;;  %v1888_v1 = vld [vmem:[#allocation8 + $0x8] sm:$0xff]   ;;  %s2113_s25 = smov 96  }
  0x4c   : > { %1666 = vmatprep.subr.bf16.mxu0 %v2111_v0  ;;  %1670 = vmatprep.mubr.msk.bf16.mxu0 %vm2112_vm0, %v2111_v0  ;;  %v1889_v2 = vld [vmem:[#allocation8] sm:$0xff]   ;;  %v1890_v3 = vld [vmem:[#allocation8 + $0x8] sm:$0xff]   ;;  %v261_v5 = vld [vmem:[%s223_s9] sm:$0xff]  ;;  %vm283_vm1 = vcmask 261120   ;;  %vm328_vm2 = vcmask 257024   ;;  %vm405_vm3 = vcmask 31744  }
  0x4d   : > { %1674 = vmatprep.subr.bf16.mxu1 %v2111_v0  ;;  %1678 = vmatprep.mubr.msk.bf16.mxu1 %vm2112_vm0, %v2111_v0  ;;  %v1891_v4 = vld [vmem:[#allocation8] sm:$0xff]   ;;  %v262_v6 = vpack.c.bf16 %v261_v5, %v261_v5  ;;  %s2114_s23 = smov 120   ;;  %s2115_s27 = smov 124   ;;  %vm467_vm4 = vcmask 1043456   ;;  %vm452_vm5 = vcmask 64512   ;;  %vm636_vm6 = vcmask 64544  }
  0x4e   : > { %279 = vrot.lane.b32.xlu0 %v1888_v1, %s2113_s25  ;;  %1675 = vmatpush3.bf16.msra.mxu1 %v1890_v3  ;;  %s2116_s10 = smov 116   ;;  %s2117_s11 = smov 112   ;;  %vm760_vm7 = vcmask 97344   ;;  %vm884_vm8 = vcmask 130144   ;;  %vm1008_vm9 = vcmask 162944   ;;  %vm1132_vm10 = vcmask 195744  }
  0x4f   : > { %1676 = vmatprep.subr.bf16.mxu1 %v2111_v0  ;;  %s2118_s12 = smov 108   ;;  %s2119_s24 = smov 104   ;;  %vm1256_vm11 = vcmask 228544   ;;  %vm1380_vm12 = vcmask 261344  }
  0x50   : > { %s2120_s13 = smov 100   ;;  %s2121_s14 = smov 4  }
  0x51   : > { %s2122_s22 = smov 8   ;;  %s2123_s29 = smov 12  }
  0x52   : > { %277 = vrot.lane.b32.xlu0 %v1889_v2, %s2113_s25  ;;  %1677 = vmatpush3.bf16.msra.mxu1 %v1891_v4  ;;  %s2124_s6 = smov 16   ;;  %s2125_s8 = smov 20  }
  0x53   : > { %1688 = vmatprep.subr.bf16.mxu1 %v2111_v0  ;;  %s2126_s9 = smov 24  }
  0x55   : > { %1679 = vmatmul.mubr.msk.bf16.vlgmr.msra.gmra.mxu1 %vm283_vm1, %v262_v6 }
  0x56   : > { %1690 = vmatprep.mubr.msk.bf16.mxu1 %vm2112_vm0, %v2111_v0 }
  0xc0   : > { %v280_v7 = vpop.permute.xlu0 %279 }
  0xc1   : > { %1667 = vmatpush3.bf16.msra.mxu0 %v280_v7 }
  0xc2   : > { %1668 = vmatprep.subr.bf16.mxu0 %v2111_v0 }
  0xc4   : > { %v278_v8 = vpop.permute.xlu0 %277 }
  0xc5   : > { %1669 = vmatpush3.bf16.msra.mxu0 %v278_v8 }
  0xc6   : > { %1682 = vmatprep.subr.bf16.mxu0 %v2111_v0 }
  0xc8   : > { %1671 = vmatmul.mubr.msk.bf16.vlgmr.msra.gmra.mxu0 %vm283_vm1, %v262_v6 }
  0xc9   : > { %1684 = vmatprep.mubr.msk.bf16.mxu0 %vm2112_vm0, %v2111_v0 }
 0x115   : > { %v395_v9 = vpop.f32.mrf.mxu1 }
 0x116   : > { %v401_v18 = vmul.f32 0.5, %v395_v9 }
 0x117   : > { %v1680_v10 = vpop.f32.mrf.mxu1 }
 0x118   : > { %v402_v23 = vpack.c.bf16 %v401_v18, %v401_v18 }
 0x119   : > { %v398_v11 = vpop.f32.mrf.mxu1 }
 0x11b   : > { %v1681_v12 = vpop.f32.mrf.mxu1 }
 0x188   : > { %v321_v13 = vpop.f32.mrf.mxu0 }
 0x189   : > { %v327_v14 = vpack.c.bf16 %v321_v13, %v321_v13 }
 0x18a   : > { %v1672_v15 = vpop.f32.mrf.mxu0 }
 0x18b   : > { %329 = vst.msk [vmem:[#allocation2] sm:$0xf] %vm328_vm2, %v327_v14 }
 0x18c   : > { %v324_v16 = vpop.f32.mrf.mxu0 }
 0x18e   : > { %v1673_v17 = vpop.f32.mrf.mxu0 }
 0x192   : > { %v403_v19 = vld [vmem:[#allocation2] sm:$0xf] }
 0x193   : > { %v1892_v20 = vld [vmem:[#allocation2] ss:$0 sps:$4 sm:$0xff]   ;;  %v410_v21 = vsel %vm405_vm3, %v403_v19, 0 }
 0x194   : > { %v1893_v22 = vld [vmem:[#allocation2] ss:$0 sps:$4 sm:$0xff]   ;;  %1683 = vmatpush3.bf16.xpose.msra.mxu0 %v410_v21  ;;  %645 = vrot.lane.b32.xlu0 %v1892_v20, %s2114_s23 }
 0x195   : > { %521 = vrot.lane.b32.xlu1 %v1893_v22, %s2115_s27  ;;  %1694 = vmatprep.subr.bf16.mxu0 %v2111_v0  ;;  %v1894_v24 = vld [vmem:[#allocation2] ss:$0 sps:$4 sm:$0xff]  }
 0x196   : > { %v1895_v25 = vld [vmem:[#allocation2] ss:$0 sps:$4 sm:$0xff]  }
 0x197   : > { %v1896_v26 = vld [vmem:[#allocation2] ss:$0 sps:$4 sm:$0xff]  }
 0x198   : > { %769 = vrot.lane.b32.xlu0 %v1894_v24, %s2116_s10  ;;  %v1897_v27 = vld [vmem:[#allocation2] ss:$0 sps:$4 sm:$0xff]  }
 0x199   : > { %516 = vrot.lane.b32.xlu1 %v402_v23, %s2115_s27  ;;  %v1898_v28 = vld [vmem:[#allocation2] ss:$0 sps:$4 sm:$0xff]  }
 0x19b   : > { %1685 = vmatmul.mubr.msk.bf16.vlgmr.msra.gmra.mxu0 %vm405_vm3, %v402_v23 }
 0x19c   : > { %893 = vrot.lane.b32.xlu0 %v1895_v25, %s2117_s11  ;;  %1696 = vmatprep.mubr.msk.bf16.mxu0 %vm2112_vm0, %v2111_v0 }
 0x19d   : > { %640 = vrot.lane.b32.xlu1 %v402_v23, %s2114_s23 }
 0x1a0   : > { %1017 = vrot.lane.b32.xlu0 %v1896_v26, %s2118_s12 }
 0x1a1   : > { %764 = vrot.lane.b32.xlu1 %v402_v23, %s2116_s10 }
 0x1a4   : > { %1141 = vrot.lane.b32.xlu0 %v1897_v27, %s2119_s24 }
 0x1a5   : > { %888 = vrot.lane.b32.xlu1 %v402_v23, %s2117_s11 }
 0x1a8   : > { %1265 = vrot.lane.b32.xlu0 %v1898_v28, %s2120_s13 }
 0x1a9   : > { %1012 = vrot.lane.b32.xlu1 %v402_v23, %s2118_s12 }
 0x1ac   : > { %333 = vrot.lane.b32.xlu0 %v327_v14, %s2113_s25  ;;  %s2127_s25 = smov 28  }
 0x1ad   : > { %1136 = vrot.lane.b32.xlu1 %v402_v23, %s2119_s24 }
 0x1b1   : > { %1260 = vrot.lane.b32.xlu1 %v402_v23, %s2120_s13 }
 0x206   : > { %v646_v29 = vpop.permute.xlu0 %645 }
 0x207   : > { %v522_v30 = vpop.permute.xlu1 %521  ;;  %v651_v35 = vsel %vm405_vm3, %v646_v29, 0 }
 0x208   : > { %v527_v31 = vsel %vm405_vm3, %v522_v30, 0 }
 0x209   : > { %1695 = vmatpush3.bf16.xpose.msra.mxu0 %v527_v31 }
 0x20a   : > { %v770_v32 = vpop.permute.xlu0 %769  ;;  %1706 = vmatprep.subr.bf16.mxu0 %v2111_v0 }
 0x20b   : > { %v517_v34 = vpop.permute.xlu1 %516  ;;  %v775_v39 = vsel %vm405_vm3, %v770_v32, 0 }
 0x20e   : > { %v894_v33 = vpop.permute.xlu0 %893 }
 0x20f   : > { %v641_v38 = vpop.permute.xlu1 %640  ;;  %v899_v43 = vsel %vm405_vm3, %v894_v33, 0 }
 0x210   : > { %1697 = vmatmul.mubr.msk.bf16.vlgmr.msra.gmra.mxu0 %vm405_vm3, %v517_v34 }
 0x211   : > { %1707 = vmatpush3.bf16.xpose.msra.mxu0 %v651_v35  ;;  %1708 = vmatprep.mubr.msk.bf16.mxu0 %vm2112_vm0, %v2111_v0 }
 0x212   : > { %v1018_v36 = vpop.permute.xlu0 %1017  ;;  %1718 = vmatprep.subr.bf16.mxu0 %v2111_v0 }
 0x213   : > { %v765_v42 = vpop.permute.xlu1 %764  ;;  %v1023_v49 = vsel %vm405_vm3, %v1018_v36, 0 }
 0x216   : > { %v1142_v37 = vpop.permute.xlu0 %1141 }
 0x217   : > { %v889_v46 = vpop.permute.xlu1 %888  ;;  %v1147_v51 = vsel %vm405_vm3, %v1142_v37, 0 }
 0x218   : > { %1709 = vmatmul.mubr.msk.bf16.vlgmr.msra.gmra.mxu0 %vm405_vm3, %v641_v38 }
 0x219   : > { %1719 = vmatpush3.bf16.xpose.msra.mxu0 %v775_v39  ;;  %1720 = vmatprep.mubr.msk.bf16.mxu0 %vm2112_vm0, %v2111_v0 }
 0x21a   : > { %v1266_v40 = vpop.permute.xlu0 %1265  ;;  %1730 = vmatprep.subr.bf16.mxu0 %v2111_v0 }
 0x21b   : > { %v1013_v50 = vpop.permute.xlu1 %1012  ;;  %v1271_v53 = vsel %vm405_vm3, %v1266_v40, 0 }
 0x21e   : > { %v334_v41 = vpop.permute.xlu0 %333 }
 0x21f   : > { %336 = vst.msk [vmem:[#allocation3] sm:$0xf] %vm328_vm2, %v334_v41  ;;  %v1137_v52 = vpop.permute.xlu1 %1136 }
 0x220   : > { %1721 = vmatmul.mubr.msk.bf16.vlgmr.msra.gmra.mxu0 %vm405_vm3, %v765_v42 }
 0x221   : > { %1731 = vmatpush3.bf16.xpose.msra.mxu0 %v899_v43  ;;  %1732 = vmatprep.mubr.msk.bf16.mxu0 %vm2112_vm0, %v2111_v0 }
 0x222   : > { %1742 = vmatprep.subr.bf16.mxu0 %v2111_v0 }
 0x223   : > { %v1261_v54 = vpop.permute.xlu1 %1260 }
 0x226   : > { %v404_v44 = vld [vmem:[#allocation3] sm:$0xf] }
 0x227   : > { %v1899_v45 = vld [vmem:[#allocation3] ss:$0 sps:$4 sm:$0xff]   ;;  %v469_v47 = vsel %vm467_vm4, %v404_v44, 0 }
 0x228   : > { %v1900_v48 = vld [vmem:[#allocation3] ss:$0 sps:$4 sm:$0xff]   ;;  %1733 = vmatmul.mubr.msk.bf16.vlgmr.msra.gmra.mxu0 %vm405_vm3, %v889_v46  ;;  %1689 = vmatpush3.bf16.msra.mxu1 %v469_v47 }
 0x229   : > { %1743 = vmatpush3.bf16.xpose.msra.mxu0 %v1023_v49  ;;  %707 = vrot.lane.b32.xlu0 %v1899_v45, %s2114_s23  ;;  %v1901_v20 = vld [vmem:[#allocation3] ss:$0 sps:$4 sm:$0xff]  }
 0x22a   : > { %583 = vrot.lane.b32.xlu1 %v1900_v48, %s2115_s27  ;;  %1744 = vmatprep.mubr.msk.bf16.mxu0 %vm2112_vm0, %v2111_v0  ;;  %v1902_v22 = vld [vmem:[#allocation3] ss:$0 sps:$4 sm:$0xff]  }
 0x22b   : > { %1754 = vmatprep.subr.bf16.mxu0 %v2111_v0  ;;  %1700 = vmatprep.subr.bf16.mxu1 %v2111_v0  ;;  %v1903_v41 = vld [vmem:[#allocation3] ss:$0 sps:$4 sm:$0xff]  }
 0x22c   : > { %v1904_v42 = vld [vmem:[#allocation3] ss:$0 sps:$4 sm:$0xff]  }
 0x22d   : > { %v1905_v43 = vld [vmem:[#allocation3] ss:$0 sps:$4 sm:$0xff]  }
 0x230   : > { %1745 = vmatmul.mubr.msk.bf16.vlgmr.msra.gmra.mxu0 %vm405_vm3, %v1013_v50 }
 0x231   : > { %1755 = vmatpush3.bf16.xpose.msra.mxu0 %v1147_v51  ;;  %1756 = vmatprep.mubr.msk.bf16.mxu0 %vm2112_vm0, %v2111_v0 }
 0x232   : > { %1766 = vmatprep.subr.bf16.mxu0 %v2111_v0 }
 0x238   : > { %1757 = vmatmul.mubr.msk.bf16.vlgmr.msra.gmra.mxu0 %vm405_vm3, %v1137_v52 }
 0x239   : > { %1767 = vmatpush3.bf16.xpose.msra.mxu0 %v1271_v53  ;;  %1768 = vmatprep.mubr.msk.bf16.mxu0 %vm2112_vm0, %v2111_v0 }
 0x23a   : > { %1778 = vmatprep.subr.bf16.mxu0 %v2111_v0 }
 0x240   : > { %1769 = vmatmul.mubr.msk.bf16.vlgmr.msra.gmra.mxu0 %vm405_vm3, %v1261_v54 }
 0x241   : > { %1782 = vmatprep.mubr.msk.bf16.mxu0 %vm2112_vm0, %v2111_v0 }
 0x25b   : > { %v446_v55 = vpop.f32.mrf.mxu0 }
 0x25c   : > { %v453_v56 = vsel %vm452_vm5, %v446_v55, -inf }
 0x25d   : > { %454 = vmax.xlane.f32.xlu1 %v453_v56  ;;  %v1686_v57 = vpop.f32.mrf.mxu0 }
 0x25f   : > { %v449_v58 = vpop.f32.mrf.mxu0 }
 0x261   : > { %v1687_v59 = vpop.f32.mrf.mxu0 }
 0x29b   : > { %v708_v44 = vpop.permute.xlu0 %707 }
 0x29c   : > { %v584_v9 = vpop.permute.xlu1 %583  ;;  %v713_v57 = vsel %vm467_vm4, %v708_v44, 0 }
 0x29d   : > { %v589_v30 = vsel %vm467_vm4, %v584_v9, 0 }
 0x2d0   : > { %v2370_v60 = vpop.f32.mrf.mxu0 }
 0x2d1   : > { %v569_v61 = vsel %vm452_vm5, %v2370_v60, -inf }
 0x2d2   : > { %570 = vmax.xlane.f32.xlu0 %v569_v61  ;;  %v1698_v62 = vpop.f32.mrf.mxu0 }
 0x2d4   : > { %v566_v63 = vpop.f32.mrf.mxu0 }
 0x2d6   : > { %v1699_v1 = vpop.f32.mrf.mxu0 }
 0x2d8   : > { %v2374_v2 = vpop.f32.mrf.mxu0 }
 0x2d9   : > { %v693_v3 = vsel %vm452_vm5, %v2374_v2, -inf }
 0x2da   : > { %694 = vmax.xlane.f32.xlu0 %v693_v3  ;;  %v1710_v4 = vpop.f32.mrf.mxu0 }
 0x2dc   : > { %v690_v5 = vpop.f32.mrf.mxu0 }
 0x2de   : > { %v1711_v6 = vpop.f32.mrf.mxu0 }
 0x2e0   : > { %v2378_v7 = vpop.f32.mrf.mxu0 }
 0x2e1   : > { %v817_v8 = vsel %vm452_vm5, %v2378_v7, -inf }
 0x2e2   : > { %818 = vmax.xlane.f32.xlu1 %v817_v8  ;;  %v1722_v10 = vpop.f32.mrf.mxu0 }
 0x2e4   : > { %v814_v11 = vpop.f32.mrf.mxu0 }
 0x2e6   : > { %v455_v12 = vpop.xlane.xlu1 %454  ;;  %v1723_v13 = vpop.f32.mrf.mxu0 }
 0x2e7   : > { %v456_v14 = vsub.f32 %v446_v55, %v455_v12 }
 0x2e8   : > { %v2382_v15 = vpop.f32.mrf.mxu0 }
 0x2e9   : > { %v457_v16 = vmul.f32 1.442695, %v456_v14  ;;  %v941_v37 = vsel %vm452_vm5, %v2382_v15, -inf }
 0x2ea   : > { %v1734_v17 = vpop.f32.mrf.mxu0 }
 0x2eb   : > { %1908 = vpow2.f32 %v457_v16 }
 0x2ec   : > { %v938_v18 = vpop.f32.mrf.mxu0 }
 0x2ee   : > { %v1735_v19 = vpop.f32.mrf.mxu0 }
 0x2f0   : > { %831 = vrot.lane.b32.xlu0 %v1901_v20, %s2116_s10  ;;  %v2385_v21 = vpop.f32.mrf.mxu0  ;;  %s1621_s10 = sshll.u32 %s2096_s18, 7  ;;  %s1452_s18 = scalar_lea.sflag [#allocation7], %s2276_s30 }
 0x2f1   : > { %v1065_v38 = vsel %vm452_vm5, %v2385_v21, -inf }
 0x2f2   : > { %v1746_v23 = vpop.f32.mrf.mxu0 }
 0x2f3   : > { %955 = vrot.lane.b32.xlu1 %v1902_v22, %s2117_s11  ;;  %s255_s11 = scalar_lea.vmem [#allocation11], %s1575_s5  ;;  %s2128_s5 = smov [#allocation11]  }
 0x2f4   : > { %v1062_v24 = vpop.f32.mrf.mxu0 }
 0x2f6   : > { %v1747_v25 = vpop.f32.mrf.mxu0 }
 0x2f8   : > { %v2388_v26 = vpop.eup %1908  ;;  %v2390_v27 = vpop.f32.mrf.mxu0 }
 0x2f9   : > { %v463_v28 = vpack.c.bf16 %v2388_v26, %v2388_v26  ;;  %v1189_v39 = vsel %vm452_vm5, %v2390_v27, -inf }
 0x2fa   : > { %v1758_v29 = vpop.f32.mrf.mxu0 }
 0x2fb   : > { %1691 = vmatmul.mubr.msk.bf16.vlgmr.msra.gmra.mxu1 %vm452_vm5, %v463_v28 }
 0x2fc   : > { %1701 = vmatpush3.bf16.msra.mxu1 %v589_v30  ;;  %v1186_v31 = vpop.f32.mrf.mxu0  ;;  %1702 = vmatprep.mubr.msk.bf16.mxu1 %vm2112_vm0, %v2111_v0 }
 0x2fd   : > { %1712 = vmatprep.subr.bf16.mxu1 %v2111_v0 }
 0x2fe   : > { %v1759_v32 = vpop.f32.mrf.mxu0 }
 0x2ff   : > { %v459_v32 = vsel %vm452_vm5, %v2388_v26, 0.0 }
 0x300   : > { %v2399_v33 = vpop.f32.mrf.mxu0 }
 0x301   : > { %v1313_v40 = vsel %vm452_vm5, %v2399_v33, -inf }
 0x302   : > { %v1770_v34 = vpop.f32.mrf.mxu0 }
 0x304   : > { %v1310_v35 = vpop.f32.mrf.mxu0 }
 0x306   : > { %v1771_v36 = vpop.f32.mrf.mxu0 }
 0x30f   : > { %942 = vmax.xlane.f32.xlu0 %v941_v37 }
 0x313   : > { %1066 = vmax.xlane.f32.xlu0 %v1065_v38 }
 0x317   : > { %1190 = vmax.xlane.f32.xlu1 %v1189_v39  ;;  %1314 = vmax.xlane.f32.xlu0 %v1313_v40 }
 0x328   : > { %1203 = vrot.lane.b32.xlu1 %v1903_v41, %s2119_s24 }
 0x32c   : > { %1327 = vrot.lane.b32.xlu1 %v1904_v42, %s2120_s13 }
 0x32d   : > { %1079 = vrot.lane.b32.xlu0 %v1905_v43, %s2118_s12  ;;  %s1466_s12 = sshll.u32 %s255_s11, 4  ;;  %s2472_s12 = int_to_ptr.vmem [resolvable:$true] %s1466_s12 }
 0x35b   : > { %v571_v45 = vpop.xlane.xlu0 %570 }
 0x35c   : > { %v572_v46 = vsub.f32 %v2370_v60, %v571_v45 }
 0x35e   : > { %v573_v47 = vmul.f32 1.442695, %v572_v46 }
 0x360   : > { %1910 = vpow2.f32 %v573_v47 }
 0x363   : > { %v695_v48 = vpop.xlane.xlu0 %694 }
 0x364   : > { %v696_v49 = vsub.f32 %v2374_v2, %v695_v48 }
 0x366   : > { %v697_v50 = vmul.f32 1.442695, %v696_v49 }
 0x367   : > { %v832_v59 = vpop.permute.xlu0 %831 }
 0x368   : > { %1912 = vpow2.f32 %v697_v50  ;;  %v837_v62 = vsel %vm467_vm4, %v832_v59, 0 }
 0x36b   : > { %v819_v51 = vpop.xlane.xlu1 %818 }
 0x36c   : > { %v820_v52 = vsub.f32 %v2378_v7, %v819_v51 }
 0x36d   : > { %v1911_v53 = vpop.eup %1910 }
 0x36e   : > { %v821_v54 = vmul.f32 1.442695, %v820_v52  ;;  %v575_v55 = vsel %vm452_vm5, %v1911_v53, 0.0  ;;  %v579_v56 = vpack.c.bf16 %v1911_v53, %v1911_v53 }
 0x36f   : > { %576 = vadd.xlane.f32.xlu1 %v575_v55  ;;  %v956_v1 = vpop.permute.xlu1 %955 }
 0x370   : > { %1914 = vpow2.f32 %v821_v54  ;;  %1703 = vmatmul.mubr.msk.bf16.vlgmr.msra.gmra.mxu1 %vm452_vm5, %v579_v56  ;;  %v961_v4 = vsel %vm467_vm4, %v956_v1, 0 }
 0x371   : > { %1713 = vmatpush3.bf16.msra.mxu1 %v713_v57  ;;  %1714 = vmatprep.mubr.msk.bf16.mxu1 %vm2112_vm0, %v2111_v0 }
 0x372   : > { %1724 = vmatprep.subr.bf16.mxu1 %v2111_v0 }
 0x375   : > { %v1913_v58 = vpop.eup %1912 }
 0x376   : > { %v699_v60 = vsel %vm452_vm5, %v1913_v58, 0.0  ;;  %v703_v61 = vpack.c.bf16 %v1913_v58, %v1913_v58 }
 0x377   : > { %700 = vadd.xlane.f32.xlu0 %v699_v60 }
 0x378   : > { %1715 = vmatmul.mubr.msk.bf16.vlgmr.msra.gmra.mxu1 %vm452_vm5, %v703_v61 }
 0x379   : > { %1725 = vmatpush3.bf16.msra.mxu1 %v837_v62  ;;  %1726 = vmatprep.mubr.msk.bf16.mxu1 %vm2112_vm0, %v2111_v0 }
 0x37a   : > { %1736 = vmatprep.subr.bf16.mxu1 %v2111_v0 }
 0x37d   : > { %v1915_v63 = vpop.eup %1914 }
 0x37e   : > { %v823_v2 = vsel %vm452_vm5, %v1915_v63, 0.0  ;;  %v827_v3 = vpack.c.bf16 %v1915_v63, %v1915_v63 }
 0x37f   : > { %824 = vadd.xlane.f32.xlu1 %v823_v2 }
 0x380   : > { %1727 = vmatmul.mubr.msk.bf16.vlgmr.msra.gmra.mxu1 %vm452_vm5, %v827_v3 }
 0x381   : > { %1737 = vmatpush3.bf16.msra.mxu1 %v961_v4  ;;  %1738 = vmatprep.mubr.msk.bf16.mxu1 %vm2112_vm0, %v2111_v0 }
 0x382   : > { %1748 = vmatprep.subr.bf16.mxu1 %v2111_v0 }
 0x398   : > { %v943_v5 = vpop.xlane.xlu0 %942 }
 0x399   : > { %v944_v6 = vsub.f32 %v2382_v15, %v943_v5 }
 0x39b   : > { %v945_v7 = vmul.f32 1.442695, %v944_v6 }
 0x39c   : > { %v1067_v8 = vpop.xlane.xlu0 %1066 }
 0x39d   : > { %1916 = vpow2.f32 %v945_v7  ;;  %v1068_v9 = vsub.f32 %v2385_v21, %v1067_v8 }
 0x39f   : > { %v1069_v10 = vmul.f32 1.442695, %v1068_v9 }
 0x3a0   : > { %v1191_v11 = vpop.xlane.xlu1 %1190  ;;  %v1315_v12 = vpop.xlane.xlu0 %1314 }
 0x3a1   : > { %1918 = vpow2.f32 %v1069_v10  ;;  %v1192_v13 = vsub.f32 %v2390_v27, %v1191_v11  ;;  %v1316_v14 = vsub.f32 %v2399_v33, %v1315_v12 }
 0x3a3   : > { %v1193_v16 = vmul.f32 1.442695, %v1192_v13  ;;  %v1317_v17 = vmul.f32 1.442695, %v1316_v14 }
 0x3a4   : > { %v1080_v19 = vpop.permute.xlu0 %1079  ;;  %v1204_v25 = vpop.permute.xlu1 %1203 }
 0x3a5   : > { %1920 = vpow2.f32 %v1193_v16  ;;  %v1085_v21 = vsel %vm467_vm4, %v1080_v19, 0  ;;  %v1209_v31 = vsel %vm467_vm4, %v1204_v25, 0 }
 0x3a6   : > { %1922 = vpow2.f32 %v1317_v17 }
 0x3a8   : > { %v1328_v33 = vpop.permute.xlu1 %1327 }
 0x3a9   : > { %v1333_v36 = vsel %vm467_vm4, %v1328_v33, 0 }
 0x3aa   : > { %v1917_v18 = vpop.eup %1916 }
 0x3ab   : > { %v947_v15 = vsel %vm452_vm5, %v1917_v18, 0.0  ;;  %v951_v20 = vpack.c.bf16 %v1917_v18, %v1917_v18  ;;  %v1906_v18 = vld [vmem:[#allocation10 + $0x8] sm:$0xff]  }
 0x3ac   : > { %948 = vadd.xlane.f32.xlu0 %v947_v15  ;;  %1779 = vmatpush3.bf16.msra.mxu0 %v1906_v18 }
 0x3ad   : > { %1739 = vmatmul.mubr.msk.bf16.vlgmr.msra.gmra.mxu1 %vm452_vm5, %v951_v20  ;;  %v1907_v20 = vld [vmem:[#allocation10] sm:$0xff]   ;;  %1780 = vmatprep.subr.bf16.mxu0 %v2111_v0 }
 0x3ae   : > { %v1919_v22 = vpop.eup %1918  ;;  %1749 = vmatpush3.bf16.msra.mxu1 %v1085_v21  ;;  %1750 = vmatprep.mubr.msk.bf16.mxu1 %vm2112_vm0, %v2111_v0 }
 0x3af   : > { %v1071_v23 = vsel %vm452_vm5, %v1919_v22, 0.0  ;;  %1760 = vmatprep.subr.bf16.mxu1 %v2111_v0  ;;  %v1075_v29 = vpack.c.bf16 %v1919_v22, %v1919_v22 }
 0x3b0   : > { %1072 = vadd.xlane.f32.xlu1 %v1071_v23  ;;  %1781 = vmatpush3.bf16.msra.mxu0 %v1907_v20 }
 0x3b2   : > { %v1921_v24 = vpop.eup %1920 }
 0x3b3   : > { %v1923_v27 = vpop.eup %1922  ;;  %v1195_v28 = vsel %vm452_vm5, %v1921_v24, 0.0  ;;  %v1199_v35 = vpack.c.bf16 %v1921_v24, %v1921_v24 }
 0x3b4   : > { %1196 = vadd.xlane.f32.xlu0 %v1195_v28  ;;  %v1319_v30 = vsel %vm452_vm5, %v1923_v27, 0.0  ;;  %v1323_v40 = vpack.c.bf16 %v1923_v27, %v1923_v27 }
 0x3b5   : > { %1320 = vadd.xlane.f32.xlu1 %v1319_v30  ;;  %1751 = vmatmul.mubr.msk.bf16.vlgmr.msra.gmra.mxu1 %vm452_vm5, %v1075_v29 }
 0x3b6   : > { %1761 = vmatpush3.bf16.msra.mxu1 %v1209_v31  ;;  %1762 = vmatprep.mubr.msk.bf16.mxu1 %vm2112_vm0, %v2111_v0 }
 0x3b7   : > { %1772 = vmatprep.subr.bf16.mxu1 %v2111_v0 }
 0x3b8   : > { %460 = vadd.xlane.f32.xlu0 %v459_v32 }
 0x3bb   : > { %v505_v34 = vpop.f32.mrf.mxu1 }
 0x3bd   : > { %v1692_v37 = vpop.f32.mrf.mxu1  ;;  %1763 = vmatmul.mubr.msk.bf16.vlgmr.msra.gmra.mxu1 %vm452_vm5, %v1199_v35 }
 0x3be   : > { %1773 = vmatpush3.bf16.msra.mxu1 %v1333_v36  ;;  %1774 = vmatprep.mubr.msk.bf16.mxu1 %vm2112_vm0, %v2111_v0 }
 0x3bf   : > { %v508_v38 = vpop.f32.mrf.mxu1 }
 0x3c1   : > { %v1693_v39 = vpop.f32.mrf.mxu1 }
 0x3c5   : > { %1775 = vmatmul.mubr.msk.bf16.vlgmr.msra.gmra.mxu1 %vm452_vm5, %v1323_v40  ;;  %v1616_v40 = vld [vmem:[%s2522_s3] ss:$0 sm:$0xff] }
 0x3f8   : > { %v577_v26 = vpop.xlane.xlu1 %576 }
 0x3f9   : > { %1924 = vrcp.f32 %v577_v26 }
 0x400   : > { %v701_v41 = vpop.xlane.xlu0 %700 }
 0x401   : > { %1926 = vrcp.f32 %v701_v41 }
 0x406   : > { %v1925_v42 = vpop.eup %1924 }
 0x408   : > { %v825_v43 = vpop.xlane.xlu1 %824 }
 0x409   : > { %1928 = vrcp.f32 %v825_v43 }
 0x40e   : > { %v1927_v49 = vpop.eup %1926 }
 0x416   : > { %v1929_v57 = vpop.eup %1928 }
 0x430   : > { %v625_v44 = vpop.f32.mrf.mxu1 }
 0x431   : > { %v631_v45 = vmul.f32 %v1925_v42, %v625_v44 }
 0x432   : > { %v1704_v46 = vpop.f32.mrf.mxu1 }
 0x433   : > { %633 = vrot.lane.b32.xlu1 %v631_v45, %s2121_s14  ;;  %s2470_s14 = scalar_lea.hbm %s2523_s4, %s1621_s10 }
 0x434   : > { %v628_v47 = vpop.f32.mrf.mxu1 }
 0x435   : > { %v949_v51 = vpop.xlane.xlu0 %948 }
 0x436   : > { %v1705_v48 = vpop.f32.mrf.mxu1 }
 0x438   : > { %v749_v50 = vpop.f32.mrf.mxu1 }
 0x439   : > { %v755_v52 = vmul.f32 %v1927_v49, %v749_v50  ;;  %v1073_v3 = vpop.xlane.xlu1 %1072 }
 0x43a   : > { %v1716_v53 = vpop.f32.mrf.mxu1 }
 0x43b   : > { %757 = vrot.lane.b32.xlu0 %v755_v52, %s2122_s22  ;;  %s2020_s22 = scalar_lea.vmem %s2472_s12, 128 }
 0x43c   : > { %v752_v54 = vpop.f32.mrf.mxu1  ;;  %p2021_p8 = scmp.ne.s32.totalorder %s2472_s12, %s2020_s22 }
 0x43d   : > { %v1197_v55 = vpop.xlane.xlu0 %1196 }
 0x43e   : > { %v1717_v56 = vpop.f32.mrf.mxu1  ;;  %v1321_v11 = vpop.xlane.xlu1 %1320  ;;  %p2022_p9 = pnand %p2021_p8, %p2249_p7 }
 0x440   : > { %v873_v58 = vpop.f32.mrf.mxu1  ;;  %p2023_p11 = pneg %p2022_p9 }
 0x441   : > { %v879_v59 = vmul.f32 %v1929_v57, %v873_v58  ;;  %v461_v60 = vpop.xlane.xlu0 %460 }
 0x442   : > { %1930 = vrcp.f32 %v461_v60  ;;  %v1728_v61 = vpop.f32.mrf.mxu1 }
 0x443   : > { %881 = vrot.lane.b32.xlu1 %v879_v59, %s2123_s29  ;;  %1932 = vrcp.f32 %v949_v51  ;;  %s2024_s29 = sshll.u32 %s2128_s5, 4  ;;  %s2025_s29 = int_to_ptr.vmem [resolvable:$false] %s2024_s29 }
 0x444   : > { %v876_v62 = vpop.f32.mrf.mxu1  ;;  %1934 = vrcp.f32 %v1073_v3  ;;  %p2027_p2 = scmp.lt.s32.totalorder %s2472_s12, %s2025_s29 }
 0x445   : > { %1936 = vrcp.f32 %v1197_v55 }
 0x446   : > { %v1729_v63 = vpop.f32.mrf.mxu1  ;;  %1938 = vrcp.f32 %v1321_v11 }
 0x44f   : > { %v1931_v1 = vpop.eup %1930 }
 0x450   : > { %v511_v2 = vmul.f32 %v1931_v1, %v505_v34  ;;  %v1933_v4 = vpop.eup %1932 }
 0x451   : > { %v1935_v10 = vpop.eup %1934 }
 0x452   : > { %512 = vst.msk [vmem:[#allocation4] sm:$0xff] %vm405_vm3, %v511_v2  ;;  %v1937_v19 = vpop.eup %1936 }
 0x453   : > { %v1939_v25 = vpop.eup %1938 }
 0x46d   : > { %v997_v5 = vpop.f32.mrf.mxu1 }
 0x46e   : > { %v1003_v6 = vmul.f32 %v1933_v4, %v997_v5 }
 0x46f   : > { %v1740_v7 = vpop.f32.mrf.mxu1 }
 0x470   : > { %1005 = vrot.lane.b32.xlu1 %v1003_v6, %s2124_s6  ;;  %s2026_s6 = scalar_lea.vmem %s2025_s29, 256 }
 0x471   : > { %v1000_v8 = vpop.f32.mrf.mxu1  ;;  %p2028_p13 = scmp.lt.s32.totalorder %s2026_s6, %s2020_s22 }
 0x473   : > { %v1741_v9 = vpop.f32.mrf.mxu1  ;;  %p2029_p0 = por %p2028_p13, %p2027_p2 }
 0x475   : > { %v1121_v12 = vpop.f32.mrf.mxu1  ;;  %p2030_p5 = pnand %p2029_p0, %p2023_p11 }
 0x476   : > { %v1127_v13 = vmul.f32 %v1935_v10, %v1121_v12 }
 0x477   : > { %v1752_v14 = vpop.f32.mrf.mxu1 }
 0x478   : > { %1129 = vrot.lane.b32.xlu0 %v1127_v13, %s2125_s8 }
 0x479   : > { %v1124_v16 = vpop.f32.mrf.mxu1 }
 0x47b   : > { %v1753_v17 = vpop.f32.mrf.mxu1 }
 0x47d   : > { %v1245_v15 = vpop.f32.mrf.mxu1 }
 0x47e   : > { %v1251_v21 = vmul.f32 %v1937_v19, %v1245_v15 }
 0x47f   : > { %v1764_v22 = vpop.f32.mrf.mxu1 }
 0x480   : > { %1253 = vrot.lane.b32.xlu1 %v1251_v21, %s2126_s9 }
 0x481   : > { %v1248_v23 = vpop.f32.mrf.mxu1 }
 0x483   : > { %v1765_v24 = vpop.f32.mrf.mxu1 }
 0x485   : > { %v1369_v27 = vpop.f32.mrf.mxu1 }
 0x486   : > { %v1375_v28 = vmul.f32 %v1939_v25, %v1369_v27 }
 0x487   : > { %v1776_v29 = vpop.f32.mrf.mxu1 }
 0x488   : > { %1377 = vrot.lane.b32.xlu0 %v1375_v28, %s2127_s25 }
 0x489   : > { %v1372_v30 = vpop.f32.mrf.mxu1 }
 0x48b   : > { %v1777_v31 = vpop.f32.mrf.mxu1 }
 0x4a5   : > { %v634_v32 = vpop.permute.xlu1 %633 }
 0x4a6   : > { %637 = vst.msk [vmem:[#allocation4] sm:$0xff] %vm636_vm6, %v634_v32 }
 0x4ad   : > { %v758_v33 = vpop.permute.xlu0 %757 }
 0x4ae   : > { %761 = vst.msk [vmem:[#allocation4] sm:$0xff] %vm760_vm7, %v758_v33 }
 0x4b5   : > { %v882_v0 = vpop.permute.xlu1 %881 }
 0x4b6   : > { %885 = vst.msk [vmem:[#allocation4] sm:$0xff] %vm884_vm8, %v882_v0 }
 0x4e2   : > { %v1006_v34 = vpop.permute.xlu1 %1005 }
 0x4e3   : > { %1009 = vst.msk [vmem:[#allocation4] sm:$0xff] %vm1008_vm9, %v1006_v34 }
 0x4ea   : > { %v1130_v35 = vpop.permute.xlu0 %1129 }
 0x4eb   : > { %1133 = vst.msk [vmem:[#allocation4] sm:$0xff] %vm1132_vm10, %v1130_v35 }
 0x4f2   : > { %v1254_v36 = vpop.permute.xlu1 %1253 }
 0x4f3   : > { %1257 = vst.msk [vmem:[#allocation4] sm:$0xff] %vm1256_vm11, %v1254_v36 }
 0x4fa   : > { %v1378_v37 = vpop.permute.xlu0 %1377 }
 0x4fb   : > { %1381 = vst.msk [vmem:[#allocation4] sm:$0xff] %vm1380_vm12, %v1378_v37 }
 0x502   : > { %v1382_v38 = vld [vmem:[#allocation4] sm:$0xff] }
 0x503   : > { %v1383_v39 = vpack.c.bf16 %v1382_v38, %v1382_v38 }
 0x505   : > { %1783 = vmatmul.mubr.msk.bf16.vlgmr.msra.gmra.mxu0 %vm283_vm1, %v1383_v39 }
 0x5c5   : > { %v1444_v26 = vpop.f32.mrf.mxu0 }
 0x5c6   : > { %v1445_v41 = vadd.f32 %v1616_v40, %v1444_v26 }
 0x5c7   : > { %v1784_v42 = vpop.f32.mrf.mxu0 }
 0x5c8   : > { %1450 = vst.msk [vmem:[%s255_s11] sm:$0xff] %vm283_vm1, %v1445_v41 }
 0x5c9   : > { %v1447_v43 = vpop.f32.mrf.mxu0 }
 0x5ca   : > { %2033 = shalt.err (!%p2030_p5)
}
 0x5cb   : > { %s2034_s8 = scalar_lea.hbm %s2470_s14, 128  ;;  %s2038_s25 = scalar_lea.hbm %s2523_s4, 256 }
 0x5cc   : > { %p2035_p10 = scmp.ne.s32.totalorder %s2470_s14, %s2034_s8  ;;  %p2039_p6 = scmp.lt.s32.totalorder %s2470_s14, %s2523_s4 }
 0x5cd   : > { %p2040_p12 = scmp.lt.s32.totalorder %s2038_s25, %s2034_s8 }
 0x5ce   : > { %p2036_p1 = pnand %p2035_p10, %p2249_p7 }
 0x5cf   : > { %p2041_p3 = por %p2040_p12, %p2039_p6 }
 0x5d0   : > { %p2037_p4 = pneg %p2036_p1 }
 0x5d2   : > { %p2042_p8 = pnand %p2041_p3, %p2037_p4 }
 0x5d4   : > { %2045 = shalt.err (!%p2042_p8)
}
 0x5d5   : > { %1796 = dma.vmem_to_hbm [thread:$0]  (%p2249_p7), %s2472_s12, 128, %s2470_s14, %s1452_s18   ;;  %v1785_v44 = vpop.f32.mrf.mxu0 }
 0x5d6 PF: > { %s1478_s10 = sand.u32 1, %s2084_s15   ;;  %p2537_p9 = scmp.ne.s32.totalorder %s2530_s26, 0 }
 0x5d7   : > { %p2538_p11 = scmp.ge.s32.totalorder %s2104_s20, 2  ;;  %s1479_s11 = scalar_lea.sflag [#allocation7], %s1478_s10 }
 0x5d9   : > { %p1810_p2 = pnand %p2538_p11, %p2537_p9 }
 0x5db   : > { %p1811_p13 = pneg %p1810_p2 }
 0x5dd   : > { %2079 = dma.done.wait (%p1811_p13), %s1479_s11, 128  }
 0x5de   : > { %2081 = vsyncadd (%p1811_p13), %s1479_s11, 4294967168  ;;  %s21_s20 = sadd.s32 1, %s2104_s20   ;;  %s2539_s15 = smov %s2088_s16 }
 0x5df   : > { %p18_p0 = scmp.ge.s32.totalorder %s21_s20, 4   ;;  %s2540_s16 = smov %s2092_s17 }
 0x5e0   : > { %s2541_s17 = smov %s2258_s7  ;;  %s2542_s18 = smov %s2100_s19 }
 0x5e1   : > { %s2543_s19 = smov %s2545_s21  ;;  %20 = sbr.rel (!%p18_p0) target bundleno = 7 (0x7), region = 94 }
 0x5e6   :  { %1484 = vsyncpa [#allocation6], 1 }
 0x5e7   :  { %1486 = vsyncpa [#allocation6 + $0x1], 1 }
 0x5e8   :  { %1487 = vsyncpa [#allocation9], 1 }
 0x5e9   :  { %1488 = vsyncpa [#allocation7], 1 }
 0x5ea   :  { %1490 = vsyncpa [#allocation7 + $0x1], 1 }

</bundles_post_ra>
